<compile_context>
chip_gen: v5e
topology: v5e:2x2
jax: 0.10.0
libtpu: 0.0.40
codegen_flags: <defaults>
</compile_context>

<pallas_src>
import functools

import jax
import jax.numpy as jnp
from jax.experimental import pallas as pl
from jax.experimental.pallas import tpu as pltpu

EPS = 1e-12  # F.normalize eps


def _round_up(n, m):
    return ((n + m - 1) // m) * m


def _ff_kernel(x_ref, whg_ref, wo_ref, o_ref, *, ni_p, compute_dtype):
    """One row-tile of the feed-forward.

    x_ref   : (tm, D_p)        activation rows
    whg_ref : (D_p, 2*ni_p)    [wh_n*hidden_scale | wg_n*gate_scale*sqrt(dim)]
    wo_ref  : (ni_p, D_p)      l2-normalized output projection
    o_ref   : (tm, D_p)        output rows
    """
    x = x_ref[...]
    whg = whg_ref[...]
    wo = wo_ref[...]

    f32 = jnp.dtype(jnp.float32)
    if jnp.dtype(compute_dtype) != f32:
        x = x.astype(compute_dtype)
        whg = whg.astype(compute_dtype)
        wo = wo.astype(compute_dtype)

    # Fused hidden+gate projection: one wide MXU matmul, f32 accumulation.
    hg = jnp.dot(x, whg, preferred_element_type=jnp.float32)   # (tm, 2*ni_p)
    hidden = hg[:, :ni_p]                                      # scales already folded in
    gate = hg[:, ni_p:]

    # silu(gate) * hidden ; dropout(p=0.0) is the identity
    h = gate * jax.nn.sigmoid(gate) * hidden                   # f32

    if jnp.dtype(compute_dtype) != f32:
        h = h.astype(compute_dtype)

    o_ref[...] = jnp.dot(h, wo, preferred_element_type=jnp.float32).astype(o_ref.dtype)


def feedforward_pallas(x, wh_t, wg_t, wo_t, hidden_scale, gate_scale,
                       *, dim, tm=256, use_bf16=False):
    """x: (B, S, dim). wh_t/wg_t: (dim, dim_inner), wo_t: (dim_inner, dim).

    Returns (B, S, dim).
    """
    B, S, D = x.shape
    assert D == dim
    dim_inner = wh_t.shape[1]
    M = B * S
    f32 = jnp.float32

    # ---- one-time weight normalization + scale folding (loop-invariant) ----
    def l2n(w, axis):
        return w / jnp.maximum(jnp.sqrt(jnp.sum(w * w, axis=axis, keepdims=True)), EPS)

    wh_n = l2n(wh_t.astype(f32), 0) * hidden_scale.astype(f32)[None, :]
    wg_n = l2n(wg_t.astype(f32), 0) * (gate_scale.astype(f32) * (float(dim) ** 0.5))[None, :]
    wo_n = l2n(wo_t.astype(f32), -1)

    # ---- pad to lane/sublane-friendly shapes (zeros are exact for matmul) ----
    D_p = _round_up(D, 128)
    Ni_p = _round_up(dim_inner, 128)
    tm = max(8, min(_round_up(tm, 8), _round_up(M, 8)))
    M_p = _round_up(M, tm)

    x2d = jnp.zeros((M_p, D_p), f32).at[:M, :D].set(x.reshape(M, D).astype(f32))
    wh_p = jnp.zeros((D_p, Ni_p), f32).at[:D, :dim_inner].set(wh_n)
    wg_p = jnp.zeros((D_p, Ni_p), f32).at[:D, :dim_inner].set(wg_n)
    whg = jnp.concatenate([wh_p, wg_p], axis=1)                # (D_p, 2*Ni_p)
    wo_p = jnp.zeros((Ni_p, D_p), f32).at[:dim_inner, :D].set(wo_n)

    compute_dtype = jnp.bfloat16 if use_bf16 else jnp.float32
    kernel = functools.partial(_ff_kernel, ni_p=Ni_p, compute_dtype=compute_dtype)

    # VMEM budget: double-buffered x/out tiles + (double-buffered) resident
    # weights + intermediates, with slack; clamp so it also fits v7x (64 MiB).
    bytes_per = 4
    needed = bytes_per * (
        2 * tm * D_p            # x tile (double buffered)
        + 2 * tm * D_p          # out tile (double buffered)
        + 2 * D_p * 2 * Ni_p    # fused hidden/gate weight
        + 2 * Ni_p * D_p        # output weight
        + 4 * tm * Ni_p         # hg / h intermediates
    )
    vmem_limit = int(min(max(2 * needed, 32 * 1024 * 1024), 56 * 1024 * 1024))

    out2d = pl.pallas_call(
        kernel,
        out_shape=jax.ShapeDtypeStruct((M_p, D_p), x.dtype),
        grid_spec=pltpu.PrefetchScalarGridSpec(
            num_scalar_prefetch=0,
            grid=(M_p // tm,),
            in_specs=[
                pl.BlockSpec((tm, D_p), lambda i: (i, 0)),          # x rows tile
                pl.BlockSpec((D_p, 2 * Ni_p), lambda i: (0, 0)),    # fused wh|wg (resident)
                pl.BlockSpec((Ni_p, D_p), lambda i: (0, 0)),        # wo (resident)
            ],
            out_specs=pl.BlockSpec((tm, D_p), lambda i: (i, 0)),
        ),
        compiler_params=pltpu.CompilerParams(
            dimension_semantics=("parallel",),   # shards M across TCs on v7x
            vmem_limit_bytes=vmem_limit,
        ),
    )(x2d, whg, wo_p)

    return out2d[:M, :D].reshape(B, S, D)


def feedforward_ref(x, wh_t, wg_t, wo_t, hidden_scale, gate_scale, *, dim):
    """Plain-JAX reference mirroring the PyTorch forward."""
    def l2n(w, axis):
        return w / jnp.maximum(jnp.linalg.norm(w, axis=axis, keepdims=True), EPS)

    hidden = x @ l2n(wh_t, 0)
    gate = x @ l2n(wg_t, 0)
    hidden = hidden * hidden_scale
    gate = gate * gate_scale * (dim ** 0.5)
    h = jax.nn.silu(gate) * hidden
    return h @ l2n(wo_t, -1)


if __name__ == "__main__":
    # Small shapes consistent with the module: dim=32, dim_inner arg=64 -> int(64*2/3)=42
    B, S, dim = 2, 8, 32
    dim_inner = int(64 * 2 / 3)  # 42

    key = jax.random.PRNGKey(0)
    kx, kh, kg, ko = jax.random.split(key, 4)

    x = jax.random.normal(kx, (B, S, dim), dtype=jnp.float32)

    # PyTorch Linear weights: to_hidden/to_gate (dim_inner, dim), to_out (dim, dim_inner).
    # Stored here pre-transposed for the kernel.
    wh_t = jax.random.normal(kh, (dim_inner, dim), dtype=jnp.float32).T     # (dim, dim_inner)
    wg_t = jax.random.normal(kg, (dim_inner, dim), dtype=jnp.float32).T     # (dim, dim_inner)
    wo_t = jax.random.normal(ko, (dim, dim_inner), dtype=jnp.float32).T     # (dim_inner, dim)

    hidden_scale = jnp.ones((dim_inner,), dtype=jnp.float32)
    gate_scale = jnp.ones((dim_inner,), dtype=jnp.float32)

    # TODO(synk): dropout with p>0 (training mode) not implemented; module default p=0.0 is identity.
    out = feedforward_pallas(x, wh_t, wg_t, wo_t, hidden_scale, gate_scale, dim=dim)
    out = jax.block_until_ready(out)

    ref = feedforward_ref(x, wh_t, wg_t, wo_t, hidden_scale, gate_scale, dim=dim)
    assert out.shape == (B, S, dim)
    assert jnp.allclose(out, ref, atol=1e-4, rtol=1e-4)

    print("KERNEL_OK")
</pallas_src>

<mosaic_0001>
module attributes {stable_mosaic.version = 11 : i64} {
  func.func @_ff_kernel(%arg0: i32, %arg1: memref<16x128xf32, #tpu.memory_space<vmem>>, %arg2: memref<128x256xf32, #tpu.memory_space<vmem>>, %arg3: memref<128x128xf32, #tpu.memory_space<vmem>>, %arg4: memref<16x128xf32, #tpu.memory_space<vmem>>) attributes {dimension_semantics = [#tpu.dimension_semantics<parallel>], iteration_bounds = array<i64: 1>, scalar_prefetch = 0 : i64, scratch_operands = 0 : i64, tpu.core_type = #tpu.core_type<tc>, window_params = [{transform_indices = @transform_0, window_bounds = array<i64: 16, 128>}, {pipeline_mode = #tpu.pipeline_mode<synchronous>, transform_indices = @transform_1, window_bounds = array<i64: 128, 256>}, {pipeline_mode = #tpu.pipeline_mode<synchronous>, transform_indices = @transform_2, window_bounds = array<i64: 128, 128>}, {transform_indices = @transform_3, window_bounds = array<i64: 16, 128>}]} {
    %c0 = arith.constant 0 : index
    %c0_0 = arith.constant 0 : index
    %0 = vector.load %arg1[%c0, %c0_0] : memref<16x128xf32, #tpu.memory_space<vmem>>, vector<16x128xf32>
    %c0_1 = arith.constant 0 : index
    %c0_2 = arith.constant 0 : index
    %1 = vector.load %arg2[%c0_1, %c0_2] : memref<128x256xf32, #tpu.memory_space<vmem>>, vector<128x256xf32>
    %c0_3 = arith.constant 0 : index
    %c0_4 = arith.constant 0 : index
    %2 = vector.load %arg3[%c0_3, %c0_4] : memref<128x128xf32, #tpu.memory_space<vmem>>, vector<128x128xf32>
    %cst = arith.constant dense<0.000000e+00> : vector<16x256xf32>
    %3 = tpu.matmul %0, %1, %cst {dimension_numbers = #tpu.dot_dimension_numbers<[1], [0], [0], [1], [0, 0, 1, 1], [], []>} : vector<16x128xf32>, vector<128x256xf32>, vector<16x256xf32> -> vector<16x256xf32>
    %4 = vector.extract_strided_slice %3 {offsets = [0, 0], sizes = [16, 128], strides = [1, 1]} : vector<16x256xf32> to vector<16x128xf32>
    %5 = vector.extract_strided_slice %3 {offsets = [0, 128], sizes = [16, 128], strides = [1, 1]} : vector<16x256xf32> to vector<16x128xf32>
    %6 = arith.negf %5 : vector<16x128xf32>
    %7 = math.exp %6 : vector<16x128xf32>
    %cst_5 = arith.constant 1.000000e+00 : f32
    %8 = vector.broadcast %cst_5 : f32 to vector<16x128xf32>
    %9 = arith.addf %8, %7 : vector<16x128xf32>
    %10 = arith.divf %8, %9 : vector<16x128xf32>
    %11 = arith.mulf %5, %10 : vector<16x128xf32>
    %12 = arith.mulf %11, %4 : vector<16x128xf32>
    %cst_6 = arith.constant dense<0.000000e+00> : vector<16x128xf32>
    %13 = tpu.matmul %12, %2, %cst_6 {dimension_numbers = #tpu.dot_dimension_numbers<[1], [0], [0], [1], [0, 0, 1, 1], [], []>} : vector<16x128xf32>, vector<128x128xf32>, vector<16x128xf32> -> vector<16x128xf32>
    %c0_7 = arith.constant 0 : index
    %c0_8 = arith.constant 0 : index
    %14 = vector.load %arg4[%c0_7, %c0_8] : memref<16x128xf32, #tpu.memory_space<vmem>>, vector<16x128xf32>
    tpu.vector_store %arg4[%c0_7, %c0_8], %13 {strides = array<i32>} : memref<16x128xf32, #tpu.memory_space<vmem>>, vector<16x128xf32>,
    return
  }
  func.func @transform_0(%arg0: i32) -> (i32, i32) {
    %c0_i32 = arith.constant 0 : i32
    %c0_i32_0 = arith.constant 0 : i32
    return %arg0, %c0_i32 : i32, i32
  }
  func.func @transform_1(%arg0: i32) -> (i32, i32) {
    %c0_i32 = arith.constant 0 : i32
    %c0_i32_0 = arith.constant 0 : i32
    %c0_i32_1 = arith.constant 0 : i32
    return %c0_i32, %c0_i32_0 : i32, i32
  }
  func.func @transform_2(%arg0: i32) -> (i32, i32) {
    %c0_i32 = arith.constant 0 : i32
    %c0_i32_0 = arith.constant 0 : i32
    %c0_i32_1 = arith.constant 0 : i32
    return %c0_i32, %c0_i32_0 : i32, i32
  }
  func.func @transform_3(%arg0: i32) -> (i32, i32) {
    %c0_i32 = arith.constant 0 : i32
    %c0_i32_0 = arith.constant 0 : i32
    return %arg0, %c0_i32 : i32, i32
  }
}

</mosaic_0001>

<bundles_post_ra>
// kernel: tpu_custom_call.1
= control target key start
LH: loop header
LB: loop body
LE: loop exit
PB: predicated region body
PF: predicated region fallthrough
CT: control target
= control target key end

     0   :  { %8 = vsyncpa [#allocation3], 0  ;;  %s430_s0 = inlined_call_operand.hbm [shape: f32[16,128], index: 0, kind: input, shape index: {}]   ;;  %s431_s1 = inlined_call_operand.hbm [shape: f32[128,256], index: 1, kind: input, shape index: {}]   ;;  %s432_s2 = inlined_call_operand.hbm [shape: f32[128,128], index: 2, kind: input, shape index: {}]   ;;  %s433_s3 = inlined_call_operand.hbm [shape: f32[16,128], index: 3, kind: output, shape index: {}]  }
   0x1   :  { %9 = vsyncpa [#allocation6], 0  ;;  %s28_s14 = sshll.u32 %s431_s1, 4  ;;  %s29_s14 = int_to_ptr.hbm [resolvable:$true] %s28_s14 }
   0x2   :  { %10 = vsyncpa [#allocation4], 0  ;;  %s381_s15 = smov [#allocation5]   ;;  %s15_s19 = sshll.u32 %s430_s0, 4  ;;  %s16_s19 = int_to_ptr.hbm [resolvable:$true] %s15_s19 }
   0x3   :  { %s30_s16 = sshll.u32 %s381_s15, 4  ;;  %s382_s20 = smov 256   ;;  %s31_s16 = int_to_ptr.vmem [resolvable:$true] %s30_s16 }
   0x4   :  { %s383_s21 = smov 16   ;;  %s384_s22 = smov [#allocation2]  }
   0x5   :  { %36 = dma.hbm_to_vmem [thread:$0]  %s29_s14, 4096, %s31_s16, [#allocation6], %s382_s20, %s382_s20, %s383_s21  }
   0x6   :  { %s17_s23 = sshll.u32 %s384_s22, 4  ;;  %s385_s24 = smov 128   ;;  %s18_s23 = int_to_ptr.vmem [resolvable:$true] %s17_s23 }
   0x7   :  { %s386_s25 = smov 8   ;;  %s41_s27 = sshll.u32 %s432_s2, 4  ;;  %s42_s27 = int_to_ptr.hbm [resolvable:$true] %s41_s27 }
   0x8   :  { %23 = dma.hbm_to_vmem [thread:$0]  %s16_s19, 256, %s18_s23, [#allocation3], %s385_s24, %s385_s24, %s386_s25  }
   0x9   :  { %s387_s28 = smov [#allocation7]  }
   0xa   :  { %s43_s0 = sshll.u32 %s387_s28, 4  ;;  %s44_s0 = int_to_ptr.vmem [resolvable:$true] %s43_s0 }
   0xb   :  { %49 = dma.hbm_to_vmem [thread:$0]  %s42_s27, 2048, %s44_s0, [#allocation6], %s385_s24, %s385_s24, %s386_s25  }
   0xc   :  { %375 = dma.done.wait [#allocation3], 256  }
   0xd   :  { %376 = vsyncadd [#allocation3], 4294967040 }
   0xe   :  { %377 = dma.done.wait [#allocation6], 6144  }
   0xf   :  { %378 = vsyncadd [#allocation6], 4294961152  ;;  %v95_v0 = vld [vmem:[#allocation5 + $0xf8] sm:$0xff]  ;;  %v93_v1 = vld [vmem:[#allocation5 + $0xe8] sm:$0xff]  ;;  %s388_s2 = smov [#allocation8]   ;;  %s231_s5 = sshll.u32 %s433_s3, 4  ;;  %s232_s5 = int_to_ptr.hbm [resolvable:$true] %s231_s5 }
  0x10   :  { %135 = vmatpush.msra.mxu1 %v95_v0  ;;  %v91_v2 = vld [vmem:[#allocation5 + $0xd8] sm:$0xff]  ;;  %v89_v3 = vld [vmem:[#allocation5 + $0xc8] sm:$0xff]  ;;  %v94_v4 = vld [vmem:[#allocation5 + $0xf0] sm:$0xff]  ;;  %s229_s29 = sshll.u32 %s388_s2, 4  ;;  %s230_s29 = int_to_ptr.vmem [resolvable:$true] %s229_s29 }
  0x11   :  { %v87_v5 = vld [vmem:[#allocation5 + $0xb8] sm:$0xff]  ;;  %112 = vmatpush.msra.mxu0 %v94_v4  ;;  %247 = vmatpush.msra.mxu3 %v94_v4  ;;  %v92_v6 = vld [vmem:[#allocation5 + $0xe0] sm:$0xff]  ;;  %v90_v7 = vld [vmem:[#allocation5 + $0xd0] sm:$0xff] }
  0x12   :  { %136 = vmatpush.msra.mxu1 %v93_v1  ;;  %v85_v8 = vld [vmem:[#allocation5 + $0xa8] sm:$0xff]  ;;  %v88_v9 = vld [vmem:[#allocation5 + $0xc0] sm:$0xff]  ;;  %v83_v10 = vld [vmem:[#allocation5 + $0x98] sm:$0xff] }
  0x13   :  { %113 = vmatpush.msra.mxu0 %v92_v6  ;;  %248 = vmatpush.msra.mxu3 %v92_v6  ;;  %v86_v11 = vld [vmem:[#allocation5 + $0xb0] sm:$0xff]  ;;  %v81_v12 = vld [vmem:[#allocation5 + $0x88] sm:$0xff]  ;;  %v84_v13 = vld [vmem:[#allocation5 + $0xa0] sm:$0xff] }
  0x14   :  { %137 = vmatpush.msra.mxu1 %v91_v2  ;;  %v79_v14 = vld [vmem:[#allocation5 + $0x78] sm:$0xff]  ;;  %v82_v15 = vld [vmem:[#allocation5 + $0x90] sm:$0xff]  ;;  %v77_v16 = vld [vmem:[#allocation5 + $0x68] sm:$0xff] }
  0x15   :  { %114 = vmatpush.msra.mxu0 %v90_v7  ;;  %249 = vmatpush.msra.mxu3 %v90_v7  ;;  %v80_v17 = vld [vmem:[#allocation5 + $0x80] sm:$0xff]  ;;  %v75_v18 = vld [vmem:[#allocation5 + $0x58] sm:$0xff]  ;;  %v78_v19 = vld [vmem:[#allocation5 + $0x70] sm:$0xff] }
  0x16   :  { %138 = vmatpush.msra.mxu1 %v89_v3  ;;  %v73_v20 = vld [vmem:[#allocation5 + $0x48] sm:$0xff]  ;;  %v76_v21 = vld [vmem:[#allocation5 + $0x60] sm:$0xff]  ;;  %v71_v22 = vld [vmem:[#allocation5 + $0x38] sm:$0xff] }
  0x17   :  { %115 = vmatpush.msra.mxu0 %v88_v9  ;;  %250 = vmatpush.msra.mxu3 %v88_v9  ;;  %v74_v23 = vld [vmem:[#allocation5 + $0x50] sm:$0xff]  ;;  %v69_v24 = vld [vmem:[#allocation5 + $0x28] sm:$0xff]  ;;  %v72_v25 = vld [vmem:[#allocation5 + $0x40] sm:$0xff] }
  0x18   :  { %139 = vmatpush.msra.mxu1 %v87_v5  ;;  %v67_v26 = vld [vmem:[#allocation5 + $0x18] sm:$0xff]  ;;  %v70_v27 = vld [vmem:[#allocation5 + $0x30] sm:$0xff]  ;;  %v65_v28 = vld [vmem:[#allocation5 + $0x8] sm:$0xff] }
  0x19   :  { %116 = vmatpush.msra.mxu0 %v86_v11  ;;  %251 = vmatpush.msra.mxu3 %v86_v11  ;;  %v62_v29 = vld [vmem:[#allocation2] sm:$0xff]  ;;  %v68_v30 = vld [vmem:[#allocation5 + $0x20] sm:$0xff]  ;;  %v63_v33 = vld [vmem:[#allocation2 + $0x8] sm:$0xff] }
  0x1a   :  { %140 = vmatpush.msra.mxu1 %v85_v8  ;;  %v66_v31 = vld [vmem:[#allocation5 + $0x10] sm:$0xff]  ;;  %v64_v32 = vld [vmem:[#allocation5] sm:$0xff]  ;;  %v111_v34 = vld [vmem:[#allocation7 + $0x78] sm:$0xff] }
  0x1b   :  { %117 = vmatpush.msra.mxu0 %v84_v13  ;;  %252 = vmatpush.msra.mxu3 %v84_v13  ;;  %v110_v35 = vld [vmem:[#allocation7 + $0x70] sm:$0xff]  ;;  %v109_v36 = vld [vmem:[#allocation7 + $0x68] sm:$0xff]  ;;  %v108_v37 = vld [vmem:[#allocation7 + $0x60] sm:$0xff] }
  0x1c   :  { %141 = vmatpush.msra.mxu1 %v83_v10  ;;  %200 = vmatpush.msra.mxu2 %v111_v34  ;;  %v107_v38 = vld [vmem:[#allocation7 + $0x58] sm:$0xff]  ;;  %v106_v39 = vld [vmem:[#allocation7 + $0x50] sm:$0xff]  ;;  %v105_v40 = vld [vmem:[#allocation7 + $0x48] sm:$0xff] }
  0x1d   :  { %118 = vmatpush.msra.mxu0 %v82_v15  ;;  %253 = vmatpush.msra.mxu3 %v82_v15  ;;  %v104_v41 = vld [vmem:[#allocation7 + $0x40] sm:$0xff]  ;;  %v103_v42 = vld [vmem:[#allocation7 + $0x38] sm:$0xff]  ;;  %v102_v43 = vld [vmem:[#allocation7 + $0x30] sm:$0xff] }
  0x1e   :  { %142 = vmatpush.msra.mxu1 %v81_v12  ;;  %201 = vmatpush.msra.mxu2 %v110_v35  ;;  %v101_v44 = vld [vmem:[#allocation7 + $0x28] sm:$0xff]  ;;  %v100_v45 = vld [vmem:[#allocation7 + $0x20] sm:$0xff]  ;;  %v99_v46 = vld [vmem:[#allocation7 + $0x18] sm:$0xff] }
  0x1f   :  { %119 = vmatpush.msra.mxu0 %v80_v17  ;;  %254 = vmatpush.msra.mxu3 %v80_v17  ;;  %v98_v47 = vld [vmem:[#allocation7 + $0x10] sm:$0xff]  ;;  %v97_v48 = vld [vmem:[#allocation7 + $0x8] sm:$0xff]  ;;  %v96_v49 = vld [vmem:[#allocation7] sm:$0xff] }
  0x20   :  { %143 = vmatpush.msra.mxu1 %v79_v14  ;;  %202 = vmatpush.msra.mxu2 %v109_v36 }
  0x21   :  { %120 = vmatpush.msra.mxu0 %v78_v19  ;;  %255 = vmatpush.msra.mxu3 %v78_v19 }
  0x22   :  { %144 = vmatpush.msra.mxu1 %v77_v16  ;;  %203 = vmatpush.msra.mxu2 %v108_v37 }
  0x23   :  { %121 = vmatpush.msra.mxu0 %v76_v21  ;;  %256 = vmatpush.msra.mxu3 %v76_v21 }
  0x24   :  { %145 = vmatpush.msra.mxu1 %v75_v18  ;;  %204 = vmatpush.msra.mxu2 %v107_v38 }
  0x25   :  { %122 = vmatpush.msra.mxu0 %v74_v23  ;;  %257 = vmatpush.msra.mxu3 %v74_v23 }
  0x26   :  { %146 = vmatpush.msra.mxu1 %v73_v20  ;;  %205 = vmatpush.msra.mxu2 %v106_v39 }
  0x27   :  { %123 = vmatpush.msra.mxu0 %v72_v25  ;;  %258 = vmatpush.msra.mxu3 %v72_v25 }
  0x28   :  { %147 = vmatpush.msra.mxu1 %v71_v22  ;;  %206 = vmatpush.msra.mxu2 %v105_v40 }
  0x29   :  { %124 = vmatpush.msra.mxu0 %v70_v27  ;;  %259 = vmatpush.msra.mxu3 %v70_v27 }
  0x2a   :  { %148 = vmatpush.msra.mxu1 %v69_v24  ;;  %207 = vmatpush.msra.mxu2 %v104_v41 }
  0x2b   :  { %125 = vmatpush.msra.mxu0 %v68_v30  ;;  %260 = vmatpush.msra.mxu3 %v68_v30 }
  0x2c   :  { %149 = vmatpush.msra.mxu1 %v67_v26  ;;  %208 = vmatpush.msra.mxu2 %v103_v42 }
  0x2d   :  { %126 = vmatpush.msra.mxu0 %v66_v31  ;;  %261 = vmatpush.msra.mxu3 %v66_v31 }
  0x2e   :  { %150 = vmatpush.msra.mxu1 %v65_v28  ;;  %209 = vmatpush.msra.mxu2 %v102_v43 }
  0x2f   :  { %151 = vmatmul.f32.vlgmr.msra.gmra.mxu1 %v62_v29  ;;  %127 = vmatpush.msra.mxu0 %v64_v32 }
  0x30   :  { %128 = vmatmul.f32.vlgmr.msra.gmra.mxu0 %v62_v29  ;;  %262 = vmatpush.msra.mxu3 %v64_v32 }
  0x31   :  { %131 = vmatmul.f32.vlgmr.msra.gmra.mxu3 %v63_v33  ;;  %210 = vmatpush.msra.mxu2 %v101_v44 }
  0x33   :  { %211 = vmatpush.msra.mxu2 %v100_v45 }
  0x35   :  { %212 = vmatpush.msra.mxu2 %v99_v46 }
  0x37   :  { %154 = vmatmul.f32.gmra.mxu1 %v63_v33  ;;  %213 = vmatpush.msra.mxu2 %v98_v47 }
  0x39   :  { %214 = vmatpush.msra.mxu2 %v97_v48 }
  0x3b   :  { %215 = vmatpush.msra.mxu2 %v96_v49 }
  0xac   :  { %v152_v50 = vpop.f32.mrf.mxu1 }
  0xad   :  { %v245_v51 = vmul.f32 -1.442695, %v152_v50  ;;  %v129_v6 = vpop.f32.mrf.mxu0 }
  0xaf   :  { %271 = vpow2.f32 %v245_v51 }
  0xb4   :  { %v155_v52 = vpop.f32.mrf.mxu1  ;;  %v132_v17 = vpop.f32.mrf.mxu3 }
  0xb5   :  { %v272_v53 = vpop.eup %271  ;;  %v246_v54 = vmul.f32 -1.442695, %v155_v52 }
  0xb6   :  { %v164_v55 = vadd.f32 1.0, %v272_v53 }
  0xb7   :  { %273 = vpow2.f32 %v246_v54 }
  0xb8   :  { %275 = vrcp.f32 %v164_v55  ;;  %v177_v61 = vand.u32 2147483648, %v164_v55  ;;  %v175_v63 = vand.u32 2147483647, %v164_v55  ;;  %vm171_vm1 = vweird.f32 %v164_v55 }
  0xba   :  { %v178_v2 = vor.u32 1.1754944e-38, %v177_v61  ;;  %vm176_vm3 = vcmp.eq.f32.partialorder %v175_v63, 8.507059e+37 }
  0xbd   :  { %v274_v56 = vpop.eup %273 }
  0xbe   :  { %v276_v57 = vpop.eup %275  ;;  %v165_v58 = vadd.f32 1.0, %v274_v56 }
  0xbf   :  { %v167_v59 = vmul.f32 %v276_v57, %v164_v55  ;;  %vm172_vm0 = vweird.f32 %v276_v57 }
  0xc0   :  { %277 = vrcp.f32 %v165_v58  ;;  %vm173_vm2 = vmor %vm171_vm1, %vm172_vm0  ;;  %v192_v9 = vand.u32 2147483648, %v165_v58  ;;  %v190_v11 = vand.u32 2147483647, %v165_v58  ;;  %vm186_vm5 = vweird.f32 %v165_v58 }
  0xc1   :  { %v168_v60 = vsub.f32 1.0, %v167_v59 }
  0xc2   :  { %v193_v14 = vor.u32 1.1754944e-38, %v192_v9  ;;  %vm191_vm7 = vcmp.eq.f32.partialorder %v190_v11, 8.507059e+37 }
  0xc3   :  { %v169_v62 = vmul.f32 %v276_v57, %v168_v60 }
  0xc5   :  { %v170_v0 = vadd.f32 %v276_v57, %v169_v62 }
  0xc6   :  { %v278_v1 = vpop.eup %277 }
  0xc7   :  { %v174_v3 = vsel %vm173_vm2, %v276_v57, %v170_v0  ;;  %v182_v4 = vmul.f32 %v278_v1, %v165_v58  ;;  %vm187_vm4 = vweird.f32 %v278_v1 }
  0xc8   :  { %v179_v5 = vsel %vm176_vm3, %v178_v2, %v174_v3  ;;  %vm188_vm6 = vmor %vm186_vm5, %vm187_vm4 }
  0xc9   :  { %v196_v7 = vmul.f32 %v179_v5, %v152_v50  ;;  %v183_v8 = vsub.f32 1.0, %v182_v4 }
  0xcb   :  { %v184_v10 = vmul.f32 %v278_v1, %v183_v8  ;;  %v198_v12 = vmul.f32 %v196_v7, %v129_v6 }
  0xcd   :  { %v185_v13 = vadd.f32 %v278_v1, %v184_v10  ;;  %216 = vmatmul.f32.vlgmr.msra.gmra.mxu2 %v198_v12 }
  0xcf   :  { %v189_v15 = vsel %vm188_vm6, %v278_v1, %v185_v13 }
  0xd0   :  { %v194_v16 = vsel %vm191_vm7, %v193_v14, %v189_v15 }
  0xd1   :  { %v197_v18 = vmul.f32 %v194_v16, %v155_v52 }
  0xd3   :  { %v199_v19 = vmul.f32 %v197_v18, %v132_v17 }
  0xd5   :  { %219 = vmatmul.f32.gmra.mxu2 %v199_v19 }
 0x150   :  { %v217_v20 = vpop.f32.mrf.mxu2 }
 0x151   :  { %223 = vst [vmem:[#allocation8] sm:$0xff] %v217_v20 }
 0x158   :  { %v220_v21 = vpop.f32.mrf.mxu2 }
 0x159   :  { %224 = vst [vmem:[#allocation8 + $0x8] sm:$0xff] %v220_v21 }
 0x15a   :  { %237 = dma.vmem_to_hbm [thread:$0]  %s230_s29, 256, %s232_s5, [#allocation4], %s385_s24, %s385_s24, %s386_s25  }
 0x15b   :  { %379 = dma.done.wait [#allocation4], 256  }
 0x15c   :  { %380 = vsyncadd [#allocation4], 4294967040 }
 0x15d   :  { %242 = vsyncpa [#allocation3], 1 }
 0x15e   :  { %243 = vsyncpa [#allocation6], 1 }
 0x15f   :  { %244 = vsyncpa [#allocation4], 1 }

</bundles_post_ra>
